<compile_context>
chip_gen: v7x
topology: tpu7x:2x2x1
jax: 0.10.0
libtpu: 0.0.40
codegen_flags: <defaults>
</compile_context>

<pallas_src>
import functools

import jax
import jax.numpy as jnp
from jax.experimental import pallas as pl
from jax.experimental.pallas import tpu as pltpu

# SELU constants (match torch.nn.functional.selu)
_SELU_ALPHA = 1.6732632423543772848170429916717
_SELU_SCALE = 1.0507009873554804934193349852946

_LANE = 128   # lane width: pad feature/class axes to this
_SUBLANE = 8  # sublane width: pad batch tiles to this

_NEG_BIG = -1e30  # finite "-inf" for masked padded logits


def _round_up(n, m):
    return ((n + m - 1) // m) * m


def _selu(x):
    return _SELU_SCALE * jnp.where(x > 0, x, _SELU_ALPHA * (jnp.exp(x) - 1.0))


def net3_kernel(x_ref, w1_ref, b1_ref, w5_ref, b5_ref, o_ref, *, out_size):
    x = x_ref[...]                                                     # (TB, IN_P)

    # fc1 + SELU  (padded input columns are zero, padded weight rows are zero)
    h = jnp.dot(x, w1_ref[...], preferred_element_type=jnp.float32)   # (TB, HID_P)
    h = _selu(h + b1_ref[...])

    # fc5 + SELU
    y = jnp.dot(h, w5_ref[...], preferred_element_type=jnp.float32)   # (TB, OUT_P)
    y = _selu(y + b5_ref[...])

    # Mask padded class columns AFTER fc5+SELU so they contribute nothing to
    # the softmax denominator (SELU(0)=0 would otherwise add exp(0-m) terms).
    col = jax.lax.broadcasted_iota(jnp.int32, y.shape, 1)
    y = jnp.where(col < out_size, y, _NEG_BIG)

    # log_softmax over class axis (dim=1), max-stabilized, f32 throughout.
    m = jnp.max(y, axis=-1, keepdims=True)
    s = y - m
    lse = jnp.log(jnp.sum(jnp.exp(s), axis=-1, keepdims=True))
    o_ref[...] = s - lse


def net3_forward(x, w1, b1, w5, b5, *, block_b=1024):
    """x: (B, IN) f32.  w1: (IN, 64), b1: (1, 64), w5: (64, OUT), b5: (1, OUT)."""
    B, IN = x.shape
    HID = w1.shape[1]
    OUT = w5.shape[1]

    IN_P = _round_up(IN, _LANE)
    HID_P = _round_up(HID, _LANE)
    OUT_P = _round_up(OUT, _LANE)

    # Batch tile: multiple of 8 sublanes, capped at block_b, then pad B up to it.
    tb = min(block_b, _round_up(B, _SUBLANE))
    Bp = _round_up(B, tb)

    # Zero-pad operands to lane-dense shapes. (In production these pads would be
    # done once at parameter-init time; XLA fuses them cheaply here.)
    x_p = jnp.zeros((Bp, IN_P), jnp.float32).at[:B, :IN].set(x)
    w1_p = jnp.zeros((IN_P, HID_P), jnp.float32).at[:IN, :HID].set(w1)
    b1_p = jnp.zeros((1, HID_P), jnp.float32).at[:, :HID].set(b1)
    w5_p = jnp.zeros((HID_P, OUT_P), jnp.float32).at[:HID, :OUT].set(w5)
    b5_p = jnp.zeros((1, OUT_P), jnp.float32).at[:, :OUT].set(b5)

    grid = (pl.cdiv(Bp, tb),)

    out_padded = pl.pallas_call(
        functools.partial(net3_kernel, out_size=OUT),
        out_shape=jax.ShapeDtypeStruct((Bp, OUT_P), jnp.float32),
        grid=grid,
        in_specs=[
            pl.BlockSpec((tb, IN_P), lambda i: (i, 0)),      # x: tiled over batch
            pl.BlockSpec((IN_P, HID_P), lambda i: (0, 0)),   # w1: resident
            pl.BlockSpec((1, HID_P), lambda i: (0, 0)),      # b1: resident
            pl.BlockSpec((HID_P, OUT_P), lambda i: (0, 0)),  # w5: resident
            pl.BlockSpec((1, OUT_P), lambda i: (0, 0)),      # b5: resident
        ],
        out_specs=pl.BlockSpec((tb, OUT_P), lambda i: (i, 0)),
        compiler_params=pltpu.CompilerParams(
            dimension_semantics=("parallel",),
        ),
    )(x_p, w1_p, b1_p, w5_p, b5_p)

    return out_padded[:B, :OUT]


def init_params(key, input_shape, output_size):
    """Deterministic init mimicking PyTorch Linear default (U(-1/sqrt(fan_in), +))."""
    k1, k2, k3, k4 = jax.random.split(key, 4)
    bound1 = 1.0 / jnp.sqrt(input_shape)
    bound5 = 1.0 / jnp.sqrt(64.0)
    w1 = jax.random.uniform(k1, (input_shape, 64), jnp.float32, -bound1, bound1)
    b1 = jax.random.uniform(k2, (1, 64), jnp.float32, -bound1, bound1)
    w5 = jax.random.uniform(k3, (64, output_size), jnp.float32, -bound5, bound5)
    b5 = jax.random.uniform(k4, (1, output_size), jnp.float32, -bound5, bound5)
    return w1, b1, w5, b5


def net3_reference(x, w1, b1, w5, b5):
    h = _selu(x @ w1 + b1)
    y = _selu(h @ w5 + b5)
    return jax.nn.log_softmax(y, axis=1)


if __name__ == "__main__":
    INPUT_SHAPE = 32   # fc1 input features
    OUTPUT_SIZE = 16   # number of classes
    BATCH = 8

    key = jax.random.PRNGKey(0)
    kx, kp = jax.random.split(key)
    x = jax.random.normal(kx, (BATCH, INPUT_SHAPE), jnp.float32)
    w1, b1, w5, b5 = init_params(kp, INPUT_SHAPE, OUTPUT_SIZE)

    out = net3_forward(x, w1, b1, w5, b5)
    out = jax.block_until_ready(out)

    ref = net3_reference(x, w1, b1, w5, b5)
    assert out.shape == (BATCH, OUTPUT_SIZE)
    assert jnp.allclose(out, ref, atol=1e-5, rtol=1e-5)

    print("KERNEL_OK")
</pallas_src>

<mosaic_0001>
module attributes {stable_mosaic.version = 11 : i64} {
  func.func @net3_kernel(%arg0: i32, %arg1: memref<8x128xf32, #tpu.memory_space<vmem>>, %arg2: memref<128x128xf32, #tpu.memory_space<vmem>>, %arg3: memref<1x128xf32, #tpu.memory_space<vmem>>, %arg4: memref<128x128xf32, #tpu.memory_space<vmem>>, %arg5: memref<1x128xf32, #tpu.memory_space<vmem>>, %arg6: memref<8x128xf32, #tpu.memory_space<vmem>>) attributes {dimension_semantics = [#tpu.dimension_semantics<parallel>], iteration_bounds = array<i64: 1>, scalar_prefetch = 0 : i64, scratch_operands = 0 : i64, tpu.core_type = #tpu.core_type<tc>, window_params = [{transform_indices = @transform_0, window_bounds = array<i64: 8, 128>}, {pipeline_mode = #tpu.pipeline_mode<synchronous>, transform_indices = @transform_1, window_bounds = array<i64: 128, 128>}, {pipeline_mode = #tpu.pipeline_mode<synchronous>, transform_indices = @transform_2, window_bounds = array<i64: 1, 128>}, {pipeline_mode = #tpu.pipeline_mode<synchronous>, transform_indices = @transform_3, window_bounds = array<i64: 128, 128>}, {pipeline_mode = #tpu.pipeline_mode<synchronous>, transform_indices = @transform_4, window_bounds = array<i64: 1, 128>}, {transform_indices = @transform_5, window_bounds = array<i64: 8, 128>}]} {
    %c0 = arith.constant 0 : index
    %c0_0 = arith.constant 0 : index
    %0 = vector.load %arg1[%c0, %c0_0] : memref<8x128xf32, #tpu.memory_space<vmem>>, vector<8x128xf32>
    %c0_1 = arith.constant 0 : index
    %c0_2 = arith.constant 0 : index
    %1 = vector.load %arg2[%c0_1, %c0_2] : memref<128x128xf32, #tpu.memory_space<vmem>>, vector<128x128xf32>
    %cst = arith.constant dense<0.000000e+00> : vector<8x128xf32>
    %2 = tpu.matmul %0, %1, %cst {dimension_numbers = #tpu.dot_dimension_numbers<[1], [0], [0], [1], [0, 0, 1, 1], [], []>} : vector<8x128xf32>, vector<128x128xf32>, vector<8x128xf32> -> vector<8x128xf32>
    %c0_3 = arith.constant 0 : index
    %c0_4 = arith.constant 0 : index
    %3 = vector.load %arg3[%c0_3, %c0_4] : memref<1x128xf32, #tpu.memory_space<vmem>>, vector<1x128xf32>
    %4 = vector.broadcast %3 : vector<1x128xf32> to vector<8x128xf32>
    %5 = arith.addf %2, %4 : vector<8x128xf32>
    %cst_5 = arith.constant 0.000000e+00 : f32
    %6 = vector.broadcast %cst_5 : f32 to vector<8x128xf32>
    %7 = arith.cmpf ogt, %5, %6 : vector<8x128xf32>
    %8 = math.exp %5 : vector<8x128xf32>
    %cst_6 = arith.constant 1.000000e+00 : f32
    %9 = vector.broadcast %cst_6 : f32 to vector<8x128xf32>
    %10 = arith.subf %8, %9 : vector<8x128xf32>
    %cst_7 = arith.constant 1.67326319 : f32
    %11 = vector.broadcast %cst_7 : f32 to vector<8x128xf32>
    %12 = arith.mulf %11, %10 : vector<8x128xf32>
    %13 = arith.select %7, %5, %12 : vector<8x128xi1>, vector<8x128xf32>
    %cst_8 = arith.constant 1.05070102 : f32
    %14 = vector.broadcast %cst_8 : f32 to vector<8x128xf32>
    %15 = arith.mulf %14, %13 : vector<8x128xf32>
    %c0_9 = arith.constant 0 : index
    %c0_10 = arith.constant 0 : index
    %16 = vector.load %arg4[%c0_9, %c0_10] : memref<128x128xf32, #tpu.memory_space<vmem>>, vector<128x128xf32>
    %cst_11 = arith.constant dense<0.000000e+00> : vector<8x128xf32>
    %17 = tpu.matmul %15, %16, %cst_11 {dimension_numbers = #tpu.dot_dimension_numbers<[1], [0], [0], [1], [0, 0, 1, 1], [], []>} : vector<8x128xf32>, vector<128x128xf32>, vector<8x128xf32> -> vector<8x128xf32>
    %c0_12 = arith.constant 0 : index
    %c0_13 = arith.constant 0 : index
    %18 = vector.load %arg5[%c0_12, %c0_13] : memref<1x128xf32, #tpu.memory_space<vmem>>, vector<1x128xf32>
    %19 = vector.broadcast %18 : vector<1x128xf32> to vector<8x128xf32>
    %20 = arith.addf %17, %19 : vector<8x128xf32>
    %cst_14 = arith.constant 0.000000e+00 : f32
    %21 = vector.broadcast %cst_14 : f32 to vector<8x128xf32>
    %22 = arith.cmpf ogt, %20, %21 : vector<8x128xf32>
    %23 = math.exp %20 : vector<8x128xf32>
    %cst_15 = arith.constant 1.000000e+00 : f32
    %24 = vector.broadcast %cst_15 : f32 to vector<8x128xf32>
    %25 = arith.subf %23, %24 : vector<8x128xf32>
    %cst_16 = arith.constant 1.67326319 : f32
    %26 = vector.broadcast %cst_16 : f32 to vector<8x128xf32>
    %27 = arith.mulf %26, %25 : vector<8x128xf32>
    %28 = arith.select %22, %20, %27 : vector<8x128xi1>, vector<8x128xf32>
    %cst_17 = arith.constant 1.05070102 : f32
    %29 = vector.broadcast %cst_17 : f32 to vector<8x128xf32>
    %30 = arith.mulf %29, %28 : vector<8x128xf32>
    %31 = tpu.iota {dimensions = array<i32: 1>} : vector<8x128xi32>
    %c16_i32 = arith.constant 16 : i32
    %32 = vector.broadcast %c16_i32 : i32 to vector<8x128xi32>
    %33 = arith.cmpi slt, %31, %32 : vector<8x128xi32>
    %cst_18 = arith.constant -1.000000e+30 : f32
    %34 = vector.broadcast %cst_18 : f32 to vector<8x128xf32>
    %35 = arith.select %33, %30, %34 : vector<8x128xi1>, vector<8x128xf32>
    %cst_19 = arith.constant dense<0xFF800000> : vector<8xf32>
    %36 = vector.multi_reduction <maximumf>, %35, %cst_19 [1] : vector<8x128xf32> to vector<8xf32>
    %37 = vector.shape_cast %36 : vector<8xf32> to vector<8x1xf32>
    %38 = vector.broadcast %37 : vector<8x1xf32> to vector<8x128xf32>
    %39 = arith.subf %35, %38 : vector<8x128xf32>
    %40 = math.exp %39 : vector<8x128xf32>
    %cst_20 = arith.constant dense<0.000000e+00> : vector<8xf32>
    %41 = vector.multi_reduction <add>, %40, %cst_20 [1] : vector<8x128xf32> to vector<8xf32>
    %42 = vector.shape_cast %41 : vector<8xf32> to vector<8x1xf32>
    %43 = math.log %42 : vector<8x1xf32>
    %44 = vector.broadcast %43 : vector<8x1xf32> to vector<8x128xf32>
    %45 = arith.subf %39, %44 : vector<8x128xf32>
    %c0_21 = arith.constant 0 : index
    %c0_22 = arith.constant 0 : index
    %46 = vector.load %arg6[%c0_21, %c0_22] : memref<8x128xf32, #tpu.memory_space<vmem>>, vector<8x128xf32>
    tpu.vector_store %arg6[%c0_21, %c0_22], %45 {strides = array<i32>} : memref<8x128xf32, #tpu.memory_space<vmem>>, vector<8x128xf32>,
    return
  }
  func.func @transform_0(%arg0: i32) -> (i32, i32) {
    %c0_i32 = arith.constant 0 : i32
    %c0_i32_0 = arith.constant 0 : i32
    return %arg0, %c0_i32 : i32, i32
  }
  func.func @transform_1(%arg0: i32) -> (i32, i32) {
    %c0_i32 = arith.constant 0 : i32
    %c0_i32_0 = arith.constant 0 : i32
    %c0_i32_1 = arith.constant 0 : i32
    return %c0_i32, %c0_i32_0 : i32, i32
  }
  func.func @transform_2(%arg0: i32) -> (i32, i32) {
    %c0_i32 = arith.constant 0 : i32
    %c0_i32_0 = arith.constant 0 : i32
    %c0_i32_1 = arith.constant 0 : i32
    return %c0_i32, %c0_i32_0 : i32, i32
  }
  func.func @transform_3(%arg0: i32) -> (i32, i32) {
    %c0_i32 = arith.constant 0 : i32
    %c0_i32_0 = arith.constant 0 : i32
    %c0_i32_1 = arith.constant 0 : i32
    return %c0_i32, %c0_i32_0 : i32, i32
  }
  func.func @transform_4(%arg0: i32) -> (i32, i32) {
    %c0_i32 = arith.constant 0 : i32
    %c0_i32_0 = arith.constant 0 : i32
    %c0_i32_1 = arith.constant 0 : i32
    return %c0_i32, %c0_i32_0 : i32, i32
  }
  func.func @transform_5(%arg0: i32) -> (i32, i32) {
    %c0_i32 = arith.constant 0 : i32
    %c0_i32_0 = arith.constant 0 : i32
    return %arg0, %c0_i32 : i32, i32
  }
}

</mosaic_0001>

<bundles_post_ra>
// kernel: tpu_custom_call.1
= control target key start
LH: loop header
LB: loop body
LE: loop exit
PB: predicated region body
PF: predicated region fallthrough
CT: control target
= control target key end

     0   :  { %10 = vsyncpa [#allocation3], 0  ;;  %s674_s0 = inlined_call_operand.hbm [shape: f32[8,128], index: 0, kind: input, shape index: {}]   ;;  %s675_s1 = inlined_call_operand.hbm [shape: f32[128,128], index: 1, kind: input, shape index: {}]   ;;  %s676_s2 = inlined_call_operand.vmem [shape: f32[1,128], index: 2, kind: input, shape index: {}]   ;;  %s677_s3 = inlined_call_operand.hbm [shape: f32[128,128], index: 3, kind: input, shape index: {}]   ;;  %s678_s4 = inlined_call_operand.vmem [shape: f32[1,128], index: 4, kind: input, shape index: {}]   ;;  %s679_s5 = inlined_call_operand.hbm [shape: f32[8,128], index: 5, kind: output, shape index: {}]  }
   0x1   :  { %11 = vsyncpa [#allocation6], 0 }
   0x2   :  { %12 = vsyncpa [#allocation4], 0  ;;  %s559_s18 = smov [#allocation5]   ;;  %s465_s22 = scalar_lea.hbm %s675_s1, 2048 }
   0x3   :  { %s28_s19 = sshll.u32 %s559_s18, 4  ;;  %p466_p0 = scmp.ne.s32.totalorder %s675_s1, %s465_s22  ;;  %s29_s19 = int_to_ptr.vmem [resolvable:$true] %s28_s19 }
   0x4   :  { %p469_p1 = scmp.lt.u32.totalorder %s465_s22, %s675_s1 }
   0x6   :  { %p471_p2 = pnand %p469_p1, %p466_p0 }
   0x8   :  { %474 = shalt.err (!%p471_p2)
}
   0x9   :  { %s475_s27 = scalar_lea.vmem %s29_s19, 2048  ;;  %p480_p4 = scmp.lt.s32.totalorder %s29_s19, %s29_s19 }
   0xa   :  { %p476_p3 = scmp.ne.s32.totalorder %s29_s19, %s475_s27  ;;  %p481_p5 = scmp.lt.s32.totalorder %s475_s27, %s475_s27 }
   0xc   :  { %p482_p6 = por %p481_p5, %p480_p4 }
   0xe   :  { %p483_p7 = pnand %p482_p6, %p476_p3 }
  0x10   :  { %486 = shalt.err (!%p483_p7)
}
  0x11   :  { %s560_s28 = smov 128   ;;  %s561_s29 = smov 8  }
  0x12   :  { %34 = dma.hbm_to_vmem [thread:$0]  %s675_s1, 2048, %s29_s19, [#allocation6], %s560_s28, %s560_s28, %s561_s29  }
  0x13   :  { %s562_s7 = smov [#allocation2]   ;;  %s563_s9 = smov [#allocation7]  }
  0x14   :  { %s19_s8 = sshll.u32 %s562_s7, 4  ;;  %s42_s10 = sshll.u32 %s563_s9, 4  ;;  %s20_s8 = int_to_ptr.vmem [resolvable:$true] %s19_s8  ;;  %s43_s10 = int_to_ptr.vmem [resolvable:$true] %s42_s10 }
  0x15   :  { %s487_s13 = scalar_lea.hbm %s674_s0, 128 }
  0x16   :  { %p488_p8 = scmp.ne.s32.totalorder %s674_s0, %s487_s13  ;;  %p491_p9 = scmp.lt.u32.totalorder %s487_s13, %s674_s0 }
  0x18   :  { %p493_p10 = pnand %p491_p9, %p488_p8 }
  0x1a   :  { %496 = shalt.err (!%p493_p10)
}
  0x1b   :  { %s497_s1 = scalar_lea.vmem %s20_s8, 128  ;;  %p502_p12 = scmp.lt.s32.totalorder %s20_s8, %s20_s8 }
  0x1c   :  { %p498_p11 = scmp.ne.s32.totalorder %s20_s8, %s497_s1  ;;  %p503_p13 = scmp.lt.s32.totalorder %s497_s1, %s497_s1 }
  0x1e   :  { %p504_p0 = por %p503_p13, %p502_p12 }
  0x20   :  { %p505_p1 = pnand %p504_p0, %p498_p11 }
  0x22   :  { %508 = shalt.err (!%p505_p1)
}
  0x23   :  { %22 = dma.hbm_to_vmem [thread:$0]  %s674_s0, 128, %s20_s8, [#allocation3]  }
  0x24   :  { %s509_s22 = scalar_lea.hbm %s677_s3, 2048 }
  0x25   :  { %p510_p2 = scmp.ne.s32.totalorder %s677_s3, %s509_s22  ;;  %p513_p3 = scmp.lt.u32.totalorder %s509_s22, %s677_s3 }
  0x27   :  { %p515_p4 = pnand %p513_p3, %p510_p2 }
  0x29   :  { %518 = shalt.err (!%p515_p4)
}
  0x2a   :  { %s519_s27 = scalar_lea.vmem %s43_s10, 2048  ;;  %p524_p6 = scmp.lt.s32.totalorder %s43_s10, %s43_s10 }
  0x2b   :  { %p520_p5 = scmp.ne.s32.totalorder %s43_s10, %s519_s27  ;;  %p525_p7 = scmp.lt.s32.totalorder %s519_s27, %s519_s27 }
  0x2d   :  { %p526_p8 = por %p525_p7, %p524_p6 }
  0x2f   :  { %p527_p9 = pnand %p526_p8, %p520_p5 }
  0x31   :  { %530 = shalt.err (!%p527_p9)
}
  0x32   :  { %48 = dma.hbm_to_vmem [thread:$0]  %s677_s3, 2048, %s43_s10, [#allocation6], %s560_s28, %s560_s28, %s561_s29  }
  0x33   :  { %553 = dma.done.wait [#allocation3], 128  }
  0x34   :  { %554 = vsyncadd [#allocation3], 4294967168 }
  0x35   :  { %555 = dma.done.wait [#allocation6], 4096  }
  0x36   :  { %556 = vsyncadd [#allocation6], 4294963200  ;;  %v564_v0 = vmov 0.0|0.0   ;;  %vm565_vm0 = vmmov 0   ;;  %v566_v1 = vmov 0.0   ;;  %v61_v2 = vld [vmem:[#allocation5] sm:$0xff] }
  0x37   :  { %400 = vmatprep.subr.bf16.mxu0 %v564_v0  ;;  %362 = vmatprep.mubr.msk.f32.mxu0 %vm565_vm0, %v566_v1  ;;  %v62_v3 = vld [vmem:[#allocation5 + $0x8] sm:$0xff]  ;;  %v63_v4 = vld [vmem:[#allocation5 + $0x10] sm:$0xff]  ;;  %v64_v6 = vld [vmem:[#allocation5 + $0x18] sm:$0xff] }
  0x38   :  { %424 = vmatprep.subr.bf16.mxu1 %v564_v0  ;;  %397 = vmatprep.mubr.msk.f32.mxu1 %vm565_vm0, %v566_v1  ;;  %v401_v5 = vpack.c.bf16 %v62_v3, %v61_v2  ;;  %v404_v7 = vpack.c.bf16 %v64_v6, %v63_v4  ;;  %v65_v8 = vld [vmem:[#allocation5 + $0x20] sm:$0xff]  ;;  %v66_v9 = vld [vmem:[#allocation5 + $0x28] sm:$0xff]  ;;  %v163_v12 = vld [vmem:[#allocation7 + $0x10] sm:$0xff]  ;;  %v261_v2 = vlaneseq }
  0x39   :  { %v161_v10 = vld [vmem:[#allocation7] sm:$0xff]  ;;  %v162_v11 = vld [vmem:[#allocation7 + $0x8] sm:$0xff]  ;;  %v164_v13 = vld [vmem:[#allocation7 + $0x18] sm:$0xff]  ;;  %v407_v14 = vpack.c.bf16 %v66_v9, %v65_v8 }
  0x3a   :  { %402 = vmatpush3.bf16.msra.mxu0 %v401_v5  ;;  %v425_v15 = vpack.c.bf16 %v162_v11, %v161_v10  ;;  %v67_v16 = vld [vmem:[#allocation5 + $0x30] sm:$0xff]  ;;  %v68_v17 = vld [vmem:[#allocation5 + $0x38] sm:$0xff]  ;;  %v428_v18 = vpack.c.bf16 %v164_v13, %v163_v12  ;;  %v69_v20 = vld [vmem:[#allocation5 + $0x40] sm:$0xff]  ;;  %v262_v5 = vand.u32 127, %v261_v2 }
  0x3b   :  { %403 = vmatprep.subr.bf16.mxu0 %v564_v0  ;;  %v410_v19 = vpack.c.bf16 %v68_v17, %v67_v16  ;;  %v70_v21 = vld [vmem:[#allocation5 + $0x48] sm:$0xff]  ;;  %v71_v23 = vld [vmem:[#allocation5 + $0x50] sm:$0xff]  ;;  %v72_v24 = vld [vmem:[#allocation5 + $0x58] sm:$0xff] }
  0x3c   :  { %426 = vmatpush3.bf16.msra.mxu1 %v425_v15  ;;  %v413_v22 = vpack.c.bf16 %v70_v21, %v69_v20  ;;  %v416_v25 = vpack.c.bf16 %v72_v24, %v71_v23  ;;  %v73_v26 = vld [vmem:[#allocation5 + $0x60] sm:$0xff]  ;;  %v74_v27 = vld [vmem:[#allocation5 + $0x68] sm:$0xff]  ;;  %v75_v29 = vld [vmem:[#allocation5 + $0x70] sm:$0xff]  ;;  %vm263_vm3 = vcmp.lt.s32.totalorder %v262_v5, 16 }
  0x3d   :  { %427 = vmatprep.subr.bf16.mxu1 %v564_v0  ;;  %v419_v28 = vpack.c.bf16 %v74_v27, %v73_v26  ;;  %v76_v30 = vld [vmem:[#allocation5 + $0x78] sm:$0xff]  ;;  %v165_v33 = vld [vmem:[#allocation7 + $0x20] sm:$0xff]  ;;  %v166_v34 = vld [vmem:[#allocation7 + $0x28] sm:$0xff] }
  0x3e   :  { %405 = vmatpush3.bf16.msra.mxu0 %v404_v7  ;;  %v422_v31 = vpack.c.bf16 %v76_v30, %v75_v29  ;;  %v60_v32 = vld [vmem:[#allocation2] sm:$0xff]  ;;  %v431_v35 = vpack.c.bf16 %v166_v34, %v165_v33  ;;  %v167_v36 = vld [vmem:[#allocation7 + $0x30] sm:$0xff]  ;;  %v169_v39 = vld [vmem:[#allocation7 + $0x40] sm:$0xff] }
  0x3f   :  { %406 = vmatprep.subr.bf16.mxu0 %v564_v0  ;;  %v168_v37 = vld [vmem:[#allocation7 + $0x38] sm:$0xff]  ;;  %v170_v40 = vld [vmem:[#allocation7 + $0x48] sm:$0xff]  ;;  %v171_v42 = vld [vmem:[#allocation7 + $0x50] sm:$0xff] }
  0x40   :  { %429 = vmatpush3.bf16.msra.mxu1 %v428_v18  ;;  %v434_v38 = vpack.c.bf16 %v168_v37, %v167_v36  ;;  %v437_v41 = vpack.c.bf16 %v170_v40, %v169_v39  ;;  %v172_v43 = vld [vmem:[#allocation7 + $0x58] sm:$0xff]  ;;  %v173_v45 = vld [vmem:[#allocation7 + $0x60] sm:$0xff]  ;;  %v174_v46 = vld [vmem:[#allocation7 + $0x68] sm:$0xff] }
  0x41   :  { %430 = vmatprep.subr.bf16.mxu1 %v564_v0  ;;  %v440_v44 = vpack.c.bf16 %v172_v43, %v171_v42  ;;  %v443_v47 = vpack.c.bf16 %v174_v46, %v173_v45  ;;  %v175_v48 = vld [vmem:[#allocation7 + $0x70] sm:$0xff]  ;;  %v176_v49 = vld [vmem:[#allocation7 + $0x78] sm:$0xff] }
  0x42   :  { %408 = vmatpush3.bf16.msra.mxu0 %v407_v14  ;;  %v446_v50 = vpack.c.bf16 %v176_v49, %v175_v48  ;;  %v292_v51 = vld [vmem:[%s676_s2] ss:$0 sm:$0xff]  ;;  %s567_s2 = smov [#allocation8]  }
  0x43   :  { %409 = vmatprep.subr.bf16.mxu0 %v564_v0  ;;  %v294_v61 = vld [vmem:[%s678_s4] ss:$0 sm:$0xff]  ;;  %s282_s4 = sshll.u32 %s567_s2, 4  ;;  %s283_s4 = int_to_ptr.vmem [resolvable:$true] %s282_s4 }
  0x44   :  { %432 = vmatpush3.bf16.msra.mxu1 %v431_v35  ;;  %s531_s7 = scalar_lea.vmem %s283_s4, 128  ;;  %p536_p11 = scmp.lt.s32.totalorder %s283_s4, %s283_s4 }
  0x45   :  { %433 = vmatprep.subr.bf16.mxu1 %v564_v0  ;;  %p532_p10 = scmp.ne.s32.totalorder %s283_s4, %s531_s7  ;;  %p537_p12 = scmp.lt.s32.totalorder %s531_s7, %s531_s7 }
  0x46   :  { %411 = vmatpush3.bf16.msra.mxu0 %v410_v19 }
  0x47   :  { %412 = vmatprep.subr.bf16.mxu0 %v564_v0  ;;  %p538_p13 = por %p537_p12, %p536_p11 }
  0x48   :  { %435 = vmatpush3.bf16.msra.mxu1 %v434_v38 }
  0x49   :  { %436 = vmatprep.subr.bf16.mxu1 %v564_v0  ;;  %p539_p0 = pnand %p538_p13, %p532_p10 }
  0x4a   :  { %414 = vmatpush3.bf16.msra.mxu0 %v413_v22 }
  0x4b   :  { %415 = vmatprep.subr.bf16.mxu0 %v564_v0 }
  0x4c   :  { %438 = vmatpush3.bf16.msra.mxu1 %v437_v41 }
  0x4d   :  { %439 = vmatprep.subr.bf16.mxu1 %v564_v0 }
  0x4e   :  { %417 = vmatpush3.bf16.msra.mxu0 %v416_v25 }
  0x4f   :  { %418 = vmatprep.subr.bf16.mxu0 %v564_v0 }
  0x50   :  { %441 = vmatpush3.bf16.msra.mxu1 %v440_v44 }
  0x51   :  { %442 = vmatprep.subr.bf16.mxu1 %v564_v0 }
  0x52   :  { %420 = vmatpush3.bf16.msra.mxu0 %v419_v28 }
  0x53   :  { %421 = vmatprep.subr.bf16.mxu0 %v564_v0 }
  0x54   :  { %444 = vmatpush3.bf16.msra.mxu1 %v443_v47 }
  0x55   :  { %445 = vmatprep.subr.bf16.mxu1 %v564_v0 }
  0x56   :  { %423 = vmatpush3.bf16.msra.mxu0 %v422_v31 }
  0x58   :  { %447 = vmatpush3.bf16.msra.mxu1 %v446_v50 }
  0x59   :  { %363 = vmatmul.mubr.f32.vlgmr.msra.gmra.mrb[0].mxu0 %v60_v32 }
 0x12c   :  { %v150_v52 = vpop.f32.mrb[0].mxu0 }
 0x12d   :  { %v151_v53 = vadd.f32 %v292_v51, %v150_v52  ;;  %v364_v54 = vpop.f32.mrb[1].mxu0 }
 0x12f   :  { %v155_v55 = vmul.f32 1.442695, %v151_v53  ;;  %vm154_vm1 = vcmp.gt.f32.partialorder %v151_v53, 0.0 }
 0x131   :  { %457 = vpow2.f32 %v155_v55 }
 0x13b   :  { %v458_v56 = vpop.eup %457 }
 0x13c   :  { %v293_v57 = vadd.f32 -1.0, %v458_v56 }
 0x13e   :  { %v158_v58 = vmul.f32 1.6732632, %v293_v57 }
 0x140   :  { %v159_v59 = vsel %vm154_vm1, %v151_v53, %v158_v58 }
 0x141   :  { %v160_v60 = vmul.f32 1.050701, %v159_v59 }
 0x143   :  { %398 = vmatmul.mubr.f32.vlgmr.msra.gmra.mrb[0].mxu1 %v160_v60 }
 0x216   :  { %v250_v62 = vpop.f32.mrb[0].mxu1 }
 0x217   :  { %v251_v63 = vadd.f32 %v294_v61, %v250_v62  ;;  %v399_v0 = vpop.f32.mrb[1].mxu1 }
 0x219   :  { %v255_v1 = vmul.f32 1.442695, %v251_v63  ;;  %vm254_vm2 = vcmp.gt.f32.partialorder %v251_v63, 0.0 }
 0x21b   :  { %459 = vpow2.f32 %v255_v1 }
 0x225   :  { %v460_v3 = vpop.eup %459 }
 0x226   :  { %v295_v4 = vadd.f32 -1.0, %v460_v3 }
 0x228   :  { %v258_v6 = vmul.f32 1.6732632, %v295_v4 }
 0x22a   :  { %v259_v7 = vsel %vm254_vm2, %v251_v63, %v258_v6 }
 0x22b   :  { %v260_v8 = vmul.f32 1.050701, %v259_v7 }
 0x22d   :  { %v264_v9 = vsel %vm263_vm3, %v260_v8, -1e+30 }
 0x22e   :  { %265 = vmax.xlane.f32.xlu0 %v264_v9 }
 0x2bb   :  { %v266_v10 = vpop.xlane.xlu0 %265 }
 0x2bc   :  { %v267_v11 = vsub.f32 %v264_v9, %v266_v10 }
 0x2be   :  { %v268_v12 = vmul.f32 1.442695, %v267_v11 }
 0x2c0   :  { %461 = vpow2.f32 %v268_v12 }
 0x2ca   :  { %v462_v13 = vpop.eup %461 }
 0x2cb   :  { %270 = vadd.xlane.f32.xlu0 %v462_v13 }
 0x358   :  { %v271_v14 = vpop.xlane.xlu0 %270 }
 0x359   :  { %463 = vlog2.f32 %v271_v14 }
 0x363   :  { %v464_v15 = vpop.eup %463 }
 0x364   :  { %v273_v16 = vmul.f32 0.6931472, %v464_v15 }
 0x366   :  { %v274_v17 = vsub.f32 %v267_v11, %v273_v16 }
 0x368   :  { %275 = vst [vmem:[#allocation8] sm:$0xff] %v274_v17 }
 0x369   :  { %542 = shalt.err (!%p539_p0)
}
 0x36a   :  { %s543_s10 = scalar_lea.hbm %s679_s5, 128 }
 0x36b   :  { %p544_p1 = scmp.ne.s32.totalorder %s679_s5, %s543_s10  ;;  %p547_p2 = scmp.lt.u32.totalorder %s543_s10, %s679_s5 }
 0x36d   :  { %p549_p3 = pnand %p547_p2, %p544_p1 }
 0x36f   :  { %552 = shalt.err (!%p549_p3)
}
 0x370   :  { %285 = dma.vmem_to_hbm [thread:$0]  %s283_s4, 128, %s679_s5, [#allocation4]  }
 0x371   :  { %557 = dma.done.wait [#allocation4], 128  }
 0x372   :  { %558 = vsyncadd [#allocation4], 4294967168 }
 0x373   :  { %289 = vsyncpa [#allocation3], 1 }
 0x374   :  { %290 = vsyncpa [#allocation6], 1 }
 0x375   :  { %291 = vsyncpa [#allocation4], 1 }

</bundles_post_ra>
